<compile_context>
chip_gen: v6e
topology: v6e:2x2x1
jax: 0.10.0
libtpu: 0.0.40
codegen_flags: <defaults>
</compile_context>

<pallas_src>
import jax
import jax.numpy as jnp
from jax.experimental import pallas as pl
from jax.experimental.pallas import tpu as pltpu


# ----------------------------- tiling helpers ------------------------------ #

def _round_up(x, m):
    return ((x + m - 1) // m) * m


def _vmem_capacity_bytes():
    try:
        info = pltpu.get_tpu_info()
        cap = getattr(info, "vmem_capacity_bytes", None)
        if cap:
            return int(cap)
    except Exception:
        pass
    return 64 * 1024 * 1024            # conservative default (v7x per-core)


_VMEM_CAP = _vmem_capacity_bytes()
_VMEM_BUDGET = _VMEM_CAP // 5          # target per-step (double-buffered) working set
_VMEM_LIMIT = min(_VMEM_CAP // 2, 96 * 1024 * 1024)


def _pick_tile_n(n):
    if n % 256 == 0:
        return 256
    if n % 128 == 0:
        return 128
    return n


def _pick_tile_m(m, k_total, tn, out_bytes, has_residual):
    """Largest M tile (from 1024 down) whose double-buffered working set fits."""
    in_b = 2  # bf16 operands
    tm = 128
    for cand in (1024, 512, 256, 128):
        need = 2 * (cand * k_total * in_b            # x blocks
                    + k_total * tn * in_b            # weight block
                    + tn * 4                         # bias block
                    + cand * tn * out_bytes          # output block
                    + (cand * tn * in_b if has_residual else 0)) \
               + cand * tn * 4                       # f32 accumulator value
        if need <= _VMEM_BUDGET:
            tm = cand
            break
    tm = min(tm, _round_up(m, 8))
    if m > 128 and tm >= m:
        # keep >=2 M-steps: software pipelining + both v7x TensorCores get work
        tm = max(128, _round_up(-(-m // 2), 8))
    return max(8, tm)


# ----------------------------- Pallas kernels ------------------------------ #

def _make_matmul_bias_silu_kernel(offs_sizes, has_residual):
    """out = silu(sum_i x_i @ W[rows_i] + bias) (+ residual); BN folded into W."""
    nb = len(offs_sizes)

    def kernel(*refs):
        x_refs = refs[:nb]
        w_ref = refs[nb]
        b_ref = refs[nb + 1]
        r_ref = refs[nb + 2] if has_residual else None
        o_ref = refs[-1]
        acc = None
        for (off, ks), x_ref in zip(offs_sizes, x_refs):
            part = jnp.dot(x_ref[...], w_ref[off:off + ks, :],
                           preferred_element_type=jnp.float32)
            acc = part if acc is None else acc + part
        y = acc + b_ref[...]
        y = y * jax.nn.sigmoid(y)                    # SiLU
        if r_ref is not None:
            y = y + r_ref[...].astype(jnp.float32)
        o_ref[...] = y.astype(o_ref.dtype)

    return kernel


def _make_conv3x3_bias_silu_kernel(has_residual):
    """Fused 3x3 conv on one image: 9 shifted dots over a halo'd VMEM tile."""

    def kernel(*refs):
        x_ref, w_ref, b_ref = refs[0], refs[1], refs[2]
        r_ref = refs[3] if has_residual else None
        o_ref = refs[-1]
        _, hp, wp, cin = x_ref.shape
        h, w = hp - 2, wp - 2
        n = o_ref.shape[-1]
        acc = None
        for t in range(9):
            dy, dx = divmod(t, 3)
            patch = x_ref[0, dy:dy + h, dx:dx + w, :].reshape(h * w, cin)
            part = jnp.dot(patch, w_ref[t * cin:(t + 1) * cin, :],
                           preferred_element_type=jnp.float32)
            acc = part if acc is None else acc + part
        y = acc + b_ref[...]
        y = y * jax.nn.sigmoid(y)                    # SiLU
        if r_ref is not None:
            y = y + r_ref[...].reshape(h * w, n).astype(jnp.float32)
        o_ref[...] = y.reshape(1, h, w, n).astype(o_ref.dtype)

    return kernel


# ------------------------------ call wrappers ------------------------------ #

def matmul_bias_silu(x_list, w2d, bias, residual2d=None, out_dtype=jnp.bfloat16):
    """Fused (sum_i x_i @ W[rows_i]) + bias + SiLU (+residual), tiled over M,N.

    x_list : list of (M, K_i) bf16 arrays whose K_i's partition W's rows
             (lets us skip materializing channel concats).
    w2d    : (sum K_i, N) bf16, BN scale pre-folded.
    bias   : (N,) f32.
    """
    m = x_list[0].shape[0]
    k_total, n = w2d.shape
    k_sizes = [int(xi.shape[1]) for xi in x_list]
    assert sum(k_sizes) == k_total
    offs_sizes, off = [], 0
    for ks in k_sizes:
        offs_sizes.append((off, ks))
        off += ks

    tn = _pick_tile_n(n)
    out_bytes = jnp.dtype(out_dtype).itemsize
    tm = _pick_tile_m(m, k_total, tn, out_bytes, residual2d is not None)
    grid = (pl.cdiv(m, tm), n // tn)

    in_specs = [pl.BlockSpec((tm, ks), lambda i, j: (i, 0)) for ks in k_sizes]
    in_specs += [
        pl.BlockSpec((k_total, tn), lambda i, j: (0, j)),
        pl.BlockSpec((1, tn), lambda i, j: (0, j)),
    ]
    args = list(x_list) + [w2d, bias.reshape(1, n).astype(jnp.float32)]
    if residual2d is not None:
        in_specs.append(pl.BlockSpec((tm, tn), lambda i, j: (i, j)))
        args.append(residual2d)

    kernel = _make_matmul_bias_silu_kernel(tuple(offs_sizes), residual2d is not None)
    return pl.pallas_call(
        kernel,
        out_shape=jax.ShapeDtypeStruct((m, n), out_dtype),
        grid=grid,
        in_specs=in_specs,
        out_specs=pl.BlockSpec((tm, tn), lambda i, j: (i, j)),
        compiler_params=pltpu.CompilerParams(
            dimension_semantics=("parallel", "parallel"),
            vmem_limit_bytes=_VMEM_LIMIT),
    )(*args)


def _conv3x3_fused_fits(h, w, c, tn, has_res, out_bytes):
    in_b = 2
    need = 2 * ((h + 2) * (w + 2) * c * in_b         # halo'd input tile
                + 9 * c * tn * in_b                  # weight block
                + tn * 4                             # bias block
                + h * w * tn * out_bytes             # output block
                + (h * w * tn * in_b if has_res else 0)) \
           + h * w * tn * 4 + 2 * h * w * c * in_b   # f32 acc + patch temporaries
    return need <= _VMEM_BUDGET


def _im2col_3x3(x_nhwc):
    b, h, w, c = x_nhwc.shape
    xp = jnp.pad(x_nhwc, ((0, 0), (1, 1), (1, 1), (0, 0)))
    patches = [xp[:, dy:dy + h, dx:dx + w, :] for dy in range(3) for dx in range(3)]
    return jnp.concatenate(patches, axis=-1)         # (B,H,W,9C), (dy,dx,c) order


def conv3x3_bn_silu(x_nhwc, w2d, bias, residual=None, out_dtype=jnp.bfloat16):
    """3x3, stride 1, pad 1 conv + folded-BN bias + SiLU (+ residual)."""
    b, h, w, c = x_nhwc.shape
    k, cout = w2d.shape
    assert k == 9 * c
    tn = _pick_tile_n(cout)
    out_bytes = jnp.dtype(out_dtype).itemsize

    fused_ok = (w % 8 == 0) and _conv3x3_fused_fits(
        h, w, c, tn, residual is not None, out_bytes)
    if fused_ok:
        xp = jnp.pad(x_nhwc, ((0, 0), (1, 1), (1, 1), (0, 0)))
        in_specs = [
            pl.BlockSpec((1, h + 2, w + 2, c), lambda bi, j: (bi, 0, 0, 0)),
            pl.BlockSpec((k, tn), lambda bi, j: (0, j)),
            pl.BlockSpec((1, tn), lambda bi, j: (0, j)),
        ]
        args = [xp, w2d, bias.reshape(1, cout).astype(jnp.float32)]
        if residual is not None:
            in_specs.append(pl.BlockSpec((1, h, w, tn), lambda bi, j: (bi, 0, 0, j)))
            args.append(residual)
        kernel = _make_conv3x3_bias_silu_kernel(residual is not None)
        return pl.pallas_call(
            kernel,
            out_shape=jax.ShapeDtypeStruct((b, h, w, cout), out_dtype),
            grid=(b, cout // tn),
            in_specs=in_specs,
            out_specs=pl.BlockSpec((1, h, w, tn), lambda bi, j: (bi, 0, 0, j)),
            compiler_params=pltpu.CompilerParams(
                dimension_semantics=("parallel", "parallel"),
                vmem_limit_bytes=_VMEM_LIMIT),
        )(*args)

    # Fallback (very large spatial*channel tiles): materialize im2col and use
    # the generic tiled matmul kernel (still bf16 + fused epilogue).
    patches2d = _im2col_3x3(x_nhwc).reshape(b * h * w, k)
    r2d = None if residual is None else residual.reshape(b * h * w, cout)
    y2d = matmul_bias_silu([patches2d], w2d, bias, residual2d=r2d,
                           out_dtype=out_dtype)
    return y2d.reshape(b, h, w, cout)


# -------------------------------- parameters -------------------------------- #

def init_c2f_params(key, c1, c2, n=1, shortcut=False, e=0.5):
    """Synthetic Conv weight + folded-BatchNorm (scale, bias) parameters."""
    c = int(c2 * e)
    eps = 1e-5

    def conv_params(k_, cin, cout, ksz):
        kw_, kg, kb, km, kv = jax.random.split(k_, 5)
        wgt = 0.1 * jax.random.normal(kw_, (cout, cin, ksz, ksz), jnp.float32)
        gamma = 0.5 + jax.random.uniform(kg, (cout,), jnp.float32)
        beta = 0.1 * jax.random.normal(kb, (cout,), jnp.float32)
        mean = 0.1 * jax.random.normal(km, (cout,), jnp.float32)
        var = 0.5 + jax.random.uniform(kv, (cout,), jnp.float32)
        scale = gamma / jnp.sqrt(var + eps)
        bias = beta - mean * scale
        return {"w": wgt, "scale": scale, "bias": bias}

    keys = jax.random.split(key, 2 + 2 * n)
    return {
        "c": c,
        "shortcut": bool(shortcut),
        "cv1": conv_params(keys[0], c1, 2 * c, 1),
        "cv2": conv_params(keys[1], (2 + n) * c, c2, 1),
        "m": [{"cv1": conv_params(keys[2 + 2 * i], c, c, 3),  # Bottleneck e=1.0
               "cv2": conv_params(keys[3 + 2 * i], c, c, 3)}
              for i in range(n)],
    }


def prepare_c2f_params(raw):
    """Fold BN scale into weights, reshape to matmul layout, cast to bf16."""

    def prep(p):
        cout, cin, kh, kw = p["w"].shape
        if kh == 1:
            w2d = jnp.transpose(p["w"].reshape(cout, cin), (1, 0))
        else:  # (dy, dx, c) row order, matching both conv3x3 paths
            w2d = jnp.transpose(p["w"], (2, 3, 1, 0)).reshape(kh * kw * cin, cout)
        w2d = w2d * p["scale"][None, :]
        return {"w2d": w2d.astype(jnp.bfloat16),
                "bias": p["bias"].astype(jnp.float32)}

    return {
        "c": raw["c"],
        "shortcut": raw["shortcut"],
        "cv1": prep(raw["cv1"]),
        "cv2": prep(raw["cv2"]),
        "m": [{"cv1": prep(bp["cv1"]), "cv2": prep(bp["cv2"])} for bp in raw["m"]],
    }


# --------------------------------- forward ---------------------------------- #

def c2f_forward(x_nchw, kp):
    """rohC2f.forward: cv1 -> chunk(2) -> n Bottlenecks(3x3,3x3) -> cv2(concat)."""
    x = jnp.transpose(x_nchw, (0, 2, 3, 1)).astype(jnp.bfloat16)   # NCHW -> NHWC
    b, h, w, _ = x.shape
    m = b * h * w
    c = kp["c"]

    y0_2d = matmul_bias_silu([x.reshape(m, -1)], kp["cv1"]["w2d"],
                             kp["cv1"]["bias"], out_dtype=jnp.bfloat16)
    y0 = y0_2d.reshape(b, h, w, 2 * c)

    branches = [y0_2d]          # cv2 rows 0..2c-1 == chunk0 ++ chunk1 == y0
    cur = y0[..., c:]           # y[-1] = second chunk
    for bp in kp["m"]:
        t = conv3x3_bn_silu(cur, bp["cv1"]["w2d"], bp["cv1"]["bias"],
                            out_dtype=jnp.bfloat16)
        res = cur if kp["shortcut"] else None        # add = shortcut and c1==c2
        t = conv3x3_bn_silu(t, bp["cv2"]["w2d"], bp["cv2"]["bias"],
                            residual=res, out_dtype=jnp.bfloat16)
        branches.append(t.reshape(m, c))
        cur = t

    # cv2 over the (never materialized) channel concat of all branches
    out2d = matmul_bias_silu(branches, kp["cv2"]["w2d"], kp["cv2"]["bias"],
                             out_dtype=jnp.float32)
    out = out2d.reshape(b, h, w, -1)
    return jnp.transpose(out, (0, 3, 1, 2))          # NHWC -> NCHW


# ----------------------------- pure-JAX reference ---------------------------- #

def _ref_conv(x, w, scale, bias, residual=None,
              compute_dtype=jnp.float32, out_dtype=jnp.float32):
    wf = (w * scale[:, None, None, None]).astype(compute_dtype)
    y = jax.lax.conv_general_dilated(
        x.astype(compute_dtype), wf, window_strides=(1, 1), padding="SAME",
        dimension_numbers=("NCHW", "OIHW", "NCHW"),
        preferred_element_type=jnp.float32)
    y = y + bias[None, :, None, None]
    y = y * jax.nn.sigmoid(y)
    if residual is not None:
        y = residual.astype(jnp.float32) + y
    return y.astype(out_dtype)


def c2f_reference(x_nchw, params, compute_dtype=jnp.float32):
    inter = jnp.float32 if compute_dtype == jnp.float32 else compute_dtype
    c = params["c"]
    p1 = params["cv1"]
    y0 = _ref_conv(x_nchw, p1["w"], p1["scale"], p1["bias"],
                   compute_dtype=compute_dtype, out_dtype=inter)
    y = [y0[:, :c], y0[:, c:]]
    for bp in params["m"]:
        inp = y[-1]
        t = _ref_conv(inp, bp["cv1"]["w"], bp["cv1"]["scale"], bp["cv1"]["bias"],
                      compute_dtype=compute_dtype, out_dtype=inter)
        res = inp if params["shortcut"] else None
        t = _ref_conv(t, bp["cv2"]["w"], bp["cv2"]["scale"], bp["cv2"]["bias"],
                      residual=res, compute_dtype=compute_dtype, out_dtype=inter)
        y.append(t)
    ycat = jnp.concatenate(y, axis=1)
    p2 = params["cv2"]
    return _ref_conv(ycat, p2["w"], p2["scale"], p2["bias"],
                     compute_dtype=compute_dtype, out_dtype=jnp.float32)


# ----------------------------------- main ------------------------------------ #

if __name__ == "__main__":
    key = jax.random.PRNGKey(0)
    kx, kp_a, kp_b = jax.random.split(key, 3)

    B, C1, C2, H, W = 2, 8, 8, 16, 16
    x = jax.random.normal(kx, (B, C1, H, W), jnp.float32)   # NCHW (PyTorch layout)

    # Config A: rohC2f defaults (shortcut=False), n=1.
    raw_a = init_c2f_params(kp_a, C1, C2, n=1, shortcut=False, e=0.5)
    out_a = jax.block_until_ready(c2f_forward(x, prepare_c2f_params(raw_a)))
    assert out_a.shape == (B, C2, H, W), out_a.shape
    ref_a_bf16 = jax.block_until_ready(c2f_reference(x, raw_a, jnp.bfloat16))
    ref_a_f32 = jax.block_until_ready(c2f_reference(x, raw_a, jnp.float32))
    assert jnp.allclose(out_a, ref_a_bf16, rtol=1e-2, atol=1e-2), \
        float(jnp.max(jnp.abs(out_a - ref_a_bf16)))
    # loose sanity bound vs full-f32 semantics (bf16 quantization noise only)
    assert jnp.allclose(out_a, ref_a_f32, rtol=1e-1, atol=1e-1), \
        float(jnp.max(jnp.abs(out_a - ref_a_f32)))

    # Config B: shortcut=True, n=2 (exercises fused residual + 3-branch cv2).
    raw_b = init_c2f_params(kp_b, C1, C2, n=2, shortcut=True, e=0.5)
    out_b = jax.block_until_ready(c2f_forward(x, prepare_c2f_params(raw_b)))
    assert out_b.shape == (B, C2, H, W), out_b.shape
    ref_b_bf16 = jax.block_until_ready(c2f_reference(x, raw_b, jnp.bfloat16))
    assert jnp.allclose(out_b, ref_b_bf16, rtol=1e-2, atol=1e-2), \
        float(jnp.max(jnp.abs(out_b - ref_b_bf16)))

    print("KERNEL_OK")
</pallas_src>

<mosaic_0001>
module attributes {stable_mosaic.version = 11 : i64} {
  func.func @kernel(%arg0: i32, %arg1: i32, %arg2: memref<256x8xbf16, #tpu.memory_space<vmem>>, %arg3: memref<8x8xbf16, #tpu.memory_space<vmem>>, %arg4: memref<1x8xf32, #tpu.memory_space<vmem>>, %arg5: memref<256x8xbf16, #tpu.memory_space<vmem>>) attributes {dimension_semantics = [#tpu.dimension_semantics<parallel>, #tpu.dimension_semantics<parallel>], iteration_bounds = array<i64: 2, 1>, scalar_prefetch = 0 : i64, scratch_operands = 0 : i64, tpu.core_type = #tpu.core_type<tc>, window_params = [{transform_indices = @transform_0, window_bounds = array<i64: 256, 8>}, {transform_indices = @transform_1, window_bounds = array<i64: 8, 8>}, {transform_indices = @transform_2, window_bounds = array<i64: 1, 8>}, {transform_indices = @transform_3, window_bounds = array<i64: 256, 8>}]} {
    %c0 = arith.constant 0 : index
    %c0_0 = arith.constant 0 : index
    %0 = vector.load %arg2[%c0, %c0_0] : memref<256x8xbf16, #tpu.memory_space<vmem>>, vector<256x8xbf16>
    %c0_1 = arith.constant 0 : index
    %c0_2 = arith.constant 0 : index
    %1 = vector.load %arg3[%c0_1, %c0_2] : memref<8x8xbf16, #tpu.memory_space<vmem>>, vector<8x8xbf16>
    %cst = arith.constant dense<0.000000e+00> : vector<256x8xf32>
    %2 = tpu.matmul %0, %1, %cst {dimension_numbers = #tpu.dot_dimension_numbers<[1], [0], [0], [1], [0, 0, 1, 1], [], []>} : vector<256x8xbf16>, vector<8x8xbf16>, vector<256x8xf32> -> vector<256x8xf32>
    %c0_3 = arith.constant 0 : index
    %c0_4 = arith.constant 0 : index
    %3 = vector.load %arg4[%c0_3, %c0_4] : memref<1x8xf32, #tpu.memory_space<vmem>>, vector<1x8xf32>
    %4 = vector.broadcast %3 : vector<1x8xf32> to vector<256x8xf32>
    %5 = arith.addf %2, %4 : vector<256x8xf32>
    %6 = arith.negf %5 : vector<256x8xf32>
    %7 = math.exp %6 : vector<256x8xf32>
    %cst_5 = arith.constant 1.000000e+00 : f32
    %8 = vector.broadcast %cst_5 : f32 to vector<256x8xf32>
    %9 = arith.addf %8, %7 : vector<256x8xf32>
    %10 = arith.divf %8, %9 : vector<256x8xf32>
    %11 = arith.mulf %5, %10 : vector<256x8xf32>
    %12 = arith.truncf %11 : vector<256x8xf32> to vector<256x8xbf16>
    %c0_6 = arith.constant 0 : index
    %c0_7 = arith.constant 0 : index
    %13 = vector.load %arg5[%c0_6, %c0_7] : memref<256x8xbf16, #tpu.memory_space<vmem>>, vector<256x8xbf16>
    tpu.vector_store %arg5[%c0_6, %c0_7], %12 {strides = array<i32>} : memref<256x8xbf16, #tpu.memory_space<vmem>>, vector<256x8xbf16>,
    return
  }
  func.func @transform_0(%arg0: i32, %arg1: i32) -> (i32, i32) {
    %c0_i32 = arith.constant 0 : i32
    %c0_i32_0 = arith.constant 0 : i32
    return %arg0, %c0_i32 : i32, i32
  }
  func.func @transform_1(%arg0: i32, %arg1: i32) -> (i32, i32) {
    %c0_i32 = arith.constant 0 : i32
    %c0_i32_0 = arith.constant 0 : i32
    return %c0_i32, %arg1 : i32, i32
  }
  func.func @transform_2(%arg0: i32, %arg1: i32) -> (i32, i32) {
    %c0_i32 = arith.constant 0 : i32
    %c0_i32_0 = arith.constant 0 : i32
    return %c0_i32, %arg1 : i32, i32
  }
  func.func @transform_3(%arg0: i32, %arg1: i32) -> (i32, i32) {
    %c0_i32 = arith.constant 0 : i32
    return %arg0, %arg1 : i32, i32
  }
}

</mosaic_0001>

<bundles_post_ra>
// kernel: tpu_custom_call.1
= control target key start
LH: loop header
LB: loop body
LE: loop exit
PB: predicated region body
PF: predicated region fallthrough
CT: control target
= control target key end

     0   :  { %s1456_s12 = smov 0   ;;  %s1458_s13 = smov 0   ;;  %s1764_s0 = inlined_call_operand.vmem [shape: bf16[512,8], index: 0, kind: input, shape index: {}]   ;;  %s1765_s1 = inlined_call_operand.vmem [shape: bf16[8,8], index: 1, kind: input, shape index: {}]   ;;  %s1766_s2 = inlined_call_operand.vmem [shape: f32[1,8], index: 2, kind: input, shape index: {}]   ;;  %s1767_s3 = inlined_call_operand.vmem [shape: bf16[512,8], index: 3, kind: output, shape index: {}]  }
   0x1   :  { %s1460_s14 = smov 0  }
   0x2 LB: > { %s25_s15 = sadd.s32 1, %s1430_s13  ;;  %p1053_p0 = scmp.ge.s32.totalorder %s1434_s14, 1  ;;  %s1434_s14 = sphi %s1460_s14, %s13_s14   ;;  %s1430_s13 = sphi %s1458_s13, %s1769_s13   ;;  %s1426_s12 = sphi %s1456_s12, %s1768_s12  }
   0x3   : > { %p27_p1 = scmp.ge.s32.totalorder %s25_s15, 2  ;;  %p169_p2 = scmp.lt.s32.totalorder %s1434_s14, 3 }
   0x5   : > { %s1771_s15 = smov (%p27_p1, %s25_s15), 0  ;;  %p170_p3 = pnand %p1053_p0, %p169_p2 }
   0x6   : > { %s1054_s18 = sshll.u32 (!%p170_p3), %s1426_s12, 5 }
   0x7   : > { %173 = sbr.rel (%p170_p3) target bundleno = 296 (0x128), region = 32  ;;  %p204_p4 = scmp.lt.s32.totalorder (!%p170_p3), %s1054_s18, 63 }
   0xc   : > { %v258_v0 = vld [vmem:[%s1765_s1] sm:$0xf]  ;;  %vm395_vm0 = vcmask 1043456   ;;  %s1773_s18 = smov (!%p204_p4, %s1054_s18), 63  ;;  %vm346_vm1 = vcmask 64512   ;;  %vm912_vm2 = vcmask 60416  }
   0xd   : > { %1242 = vmatprep.subr.msk.bf16.mxu0 %vm395_vm0, %v258_v0  ;;  %1243 = vmatprep.subr.msk.bf16.mxu1 %vm395_vm0, %v258_v0  ;;  %v397_v1 = vsel %vm395_vm0, %v258_v0, 0  ;;  %s1055_s19 = sshll.u32 %s1773_s18, 2  ;;  %v1522_v18 = vld [vmem:[%s1766_s2] ss:$0 sm:$0xff] }
   0xe   : > { %1207 = vmatpush3.bf16.msra.mxu0 %v397_v1  ;;  %1241 = vmatpush3.bf16.msra.mxu1 %v397_v1  ;;  %s1485_s22 = scalar_lea.vmem %s1764_s0, %s1055_s19  ;;  %s1634_s27 = scalar_lea.vmem %s1767_s3, %s1055_s19 }
   0xf   : > { %v1268_v2 = vld [vmem:[%s1485_s22] sm:$0xff]   ;;  %v1270_v4 = vld [vmem:[%s1485_s22 + $0x8] sm:$0xff]   ;;  %v1272_v6 = vld [vmem:[%s1485_s22 + $0x10] sm:$0xff]  }
  0x10   : > { %v1269_v3 = vld [vmem:[%s1485_s22 + $0x40] sm:$0xff]   ;;  %1208 = vmatprep.mubr.msk.bf16.mxu0 %vm346_vm1, %v1268_v2  ;;  %v1271_v5 = vld [vmem:[%s1485_s22 + $0x48] sm:$0xff]   ;;  %v1273_v7 = vld [vmem:[%s1485_s22 + $0x50] sm:$0xff]  }
  0x11   : > { %1224 = vmatprep.mubr.msk.bf16.mxu1 %vm346_vm1, %v1269_v3  ;;  %1209 = vmatmul.mubr.msk.bf16.vlgmr.msra.gmra.mxu0 %vm346_vm1, %v1270_v4  ;;  %v1274_v8 = vld [vmem:[%s1485_s22 + $0x18] sm:$0xff]   ;;  %v1276_v10 = vld [vmem:[%s1485_s22 + $0x20] sm:$0xff]   ;;  %v1278_v12 = vld [vmem:[%s1485_s22 + $0x28] sm:$0xff]  }
  0x12   : > { %1225 = vmatmul.mubr.msk.bf16.vlgmr.msra.gmra.mxu1 %vm346_vm1, %v1271_v5  ;;  %1212 = vmatprep.mubr.msk.bf16.mxu0 %vm346_vm1, %v1272_v6  ;;  %v1275_v9 = vld [vmem:[%s1485_s22 + $0x58] sm:$0xff]   ;;  %v1277_v11 = vld [vmem:[%s1485_s22 + $0x60] sm:$0xff]   ;;  %v1279_v13 = vld [vmem:[%s1485_s22 + $0x68] sm:$0xff]  }
  0x13   : > { %1228 = vmatprep.mubr.msk.bf16.mxu1 %vm346_vm1, %v1273_v7  ;;  %v1280_v14 = vld [vmem:[%s1485_s22 + $0x30] sm:$0xff]   ;;  %v1282_v16 = vld [vmem:[%s1485_s22 + $0x38] sm:$0xff]  }
  0x14   : > { %v1281_v15 = vld [vmem:[%s1485_s22 + $0x70] sm:$0xff]   ;;  %v1283_v17 = vld [vmem:[%s1485_s22 + $0x78] sm:$0xff]  }
  0x19   : > { %1213 = vmatmul.mubr.msk.bf16.gmra.mxu0 %vm346_vm1, %v1274_v8 }
  0x1a   : > { %1229 = vmatmul.mubr.msk.bf16.gmra.mxu1 %vm346_vm1, %v1275_v9  ;;  %1216 = vmatprep.mubr.msk.bf16.mxu0 %vm346_vm1, %v1276_v10 }
  0x1b   : > { %1232 = vmatprep.mubr.msk.bf16.mxu1 %vm346_vm1, %v1277_v11 }
  0x21   : > { %1217 = vmatmul.mubr.msk.bf16.gmra.mxu0 %vm346_vm1, %v1278_v12 }
  0x22   : > { %1233 = vmatmul.mubr.msk.bf16.gmra.mxu1 %vm346_vm1, %v1279_v13  ;;  %1220 = vmatprep.mubr.msk.bf16.mxu0 %vm346_vm1, %v1280_v14 }
  0x23   : > { %1236 = vmatprep.mubr.msk.bf16.mxu1 %vm346_vm1, %v1281_v15 }
  0x29   : > { %1221 = vmatmul.mubr.msk.bf16.gmra.mxu0 %vm346_vm1, %v1282_v16 }
  0x2a   : > { %1237 = vmatmul.mubr.msk.bf16.gmra.mxu1 %vm346_vm1, %v1283_v17 }
  0xd1   : > { %v1210_v19 = vpop.f32.mrf.mxu0 }
  0xd2   : > { %v1525_v20 = vadd.f32 %v1210_v19, %v1522_v18  ;;  %v1226_v21 = vpop.f32.mrf.mxu1 }
  0xd3   : > { %v1528_v22 = vadd.f32 %v1226_v21, %v1522_v18  ;;  %v433_v23 = vpop.f32.mrf.mxu0 }
  0xd4   : > { %v1093_v24 = vmul.f32 -1.442695, %v1525_v20  ;;  %v1532_v25 = vadd.f32 %v1522_v18, %v433_v23  ;;  %v497_v26 = vpop.f32.mrf.mxu1 }
  0xd5   : > { %v1109_v27 = vmul.f32 -1.442695, %v1528_v22  ;;  %v1536_v28 = vadd.f32 %v1522_v18, %v497_v26  ;;  %v1211_v29 = vpop.f32.mrf.mxu0 }
  0xd6   : > { %1284 = vpow2.f32 %v1093_v24  ;;  %v1091_v30 = vmul.f32 -1.442695, %v1532_v25  ;;  %v1540_v31 = vadd.f32 %v1211_v29, %v1522_v18  ;;  %v1227_v32 = vpop.f32.mrf.mxu1 }
  0xd7   : > { %1286 = vpow2.f32 %v1109_v27  ;;  %v1107_v33 = vmul.f32 -1.442695, %v1536_v28  ;;  %v1544_v34 = vadd.f32 %v1227_v32, %v1522_v18  ;;  %v436_v35 = vpop.f32.mrf.mxu0 }
  0xd8   : > { %1288 = vpow2.f32 %v1091_v30  ;;  %v1094_v36 = vmul.f32 -1.442695, %v1540_v31  ;;  %v1548_v37 = vadd.f32 %v1522_v18, %v436_v35  ;;  %v500_v38 = vpop.f32.mrf.mxu1 }
  0xd9   : > { %1290 = vpow2.f32 %v1107_v33  ;;  %v1110_v39 = vmul.f32 -1.442695, %v1544_v34  ;;  %v1552_v40 = vadd.f32 %v1522_v18, %v500_v38  ;;  %v1214_v41 = vpop.f32.mrf.mxu0 }
  0xda   : > { %1292 = vpow2.f32 %v1094_v36  ;;  %v1092_v42 = vmul.f32 -1.442695, %v1548_v37  ;;  %v1556_v43 = vadd.f32 %v1214_v41, %v1522_v18  ;;  %v1230_v44 = vpop.f32.mrf.mxu1 }
  0xdb   : > { %1294 = vpow2.f32 %v1110_v39  ;;  %v1108_v45 = vmul.f32 -1.442695, %v1552_v40  ;;  %v1560_v46 = vadd.f32 %v1230_v44, %v1522_v18  ;;  %v449_v47 = vpop.f32.mrf.mxu0 }
  0xdc   : > { %1296 = vpow2.f32 %v1092_v42  ;;  %v1097_v48 = vmul.f32 -1.442695, %v1556_v43  ;;  %v1564_v49 = vadd.f32 %v1522_v18, %v449_v47  ;;  %v513_v50 = vpop.f32.mrf.mxu1 }
  0xdd   : > { %1298 = vpow2.f32 %v1108_v45  ;;  %v1113_v51 = vmul.f32 -1.442695, %v1560_v46  ;;  %v1568_v52 = vadd.f32 %v1522_v18, %v513_v50  ;;  %v1215_v53 = vpop.f32.mrf.mxu0 }
  0xde   : > { %1300 = vpow2.f32 %v1097_v48  ;;  %v1095_v54 = vmul.f32 -1.442695, %v1564_v49  ;;  %v1572_v55 = vadd.f32 %v1215_v53, %v1522_v18  ;;  %v1231_v56 = vpop.f32.mrf.mxu1 }
  0xdf   : > { %1302 = vpow2.f32 %v1113_v51  ;;  %v1111_v57 = vmul.f32 -1.442695, %v1568_v52  ;;  %v1576_v58 = vadd.f32 %v1231_v56, %v1522_v18  ;;  %v452_v59 = vpop.f32.mrf.mxu0 }
  0xe0   : > { %1304 = vpow2.f32 %v1095_v54  ;;  %v1098_v60 = vmul.f32 -1.442695, %v1572_v55  ;;  %v1580_v61 = vadd.f32 %v1522_v18, %v452_v59  ;;  %v516_v62 = vpop.f32.mrf.mxu1 }
  0xe1   : > { %1306 = vpow2.f32 %v1111_v57  ;;  %v1114_v63 = vmul.f32 -1.442695, %v1576_v58  ;;  %v1584_v0 = vadd.f32 %v1522_v18, %v516_v62  ;;  %v1218_v1 = vpop.f32.mrf.mxu0 }
  0xe2   : > { %1308 = vpow2.f32 %v1098_v60  ;;  %v1096_v2 = vmul.f32 -1.442695, %v1580_v61  ;;  %v1234_v3 = vpop.f32.mrf.mxu1  ;;  %v1589_v26 = vadd.f32 %v1218_v1, %v1522_v18 }
  0xe3   : > { %v1285_v4 = vpop.eup %1284  ;;  %1310 = vpow2.f32 %v1114_v63  ;;  %v1112_v5 = vmul.f32 -1.442695, %v1584_v0  ;;  %v465_v6 = vpop.f32.mrf.mxu0  ;;  %v1592_v36 = vadd.f32 %v1234_v3, %v1522_v18 }
  0xe4   : > { %v1287_v7 = vpop.eup %1286  ;;  %v658_v8 = vadd.f32 1.0, %v1285_v4  ;;  %1312 = vpow2.f32 %v1096_v2  ;;  %v529_v9 = vpop.f32.mrf.mxu1  ;;  %v1595_v41 = vadd.f32 %v1522_v18, %v465_v6  ;;  %v1101_v45 = vmul.f32 -1.442695, %v1589_v26 }
  0xe5   : > { %v1289_v10 = vpop.eup %1288  ;;  %v674_v11 = vadd.f32 1.0, %v1287_v7  ;;  %1314 = vpow2.f32 %v1112_v5  ;;  %v1219_v12 = vpop.f32.mrf.mxu0  ;;  %v1599_v51 = vadd.f32 %v1522_v18, %v529_v9  ;;  %v1117_v59 = vmul.f32 -1.442695, %v1592_v36 }
  0xe6   : > { %v1291_v13 = vpop.eup %1290  ;;  %1316 = vrcp.f32 %v658_v8  ;;  %v656_v14 = vadd.f32 1.0, %v1289_v10  ;;  %v1235_v15 = vpop.f32.mrf.mxu1  ;;  %v1602_v53 = vadd.f32 %v1219_v12, %v1522_v18  ;;  %v1099_v1 = vmul.f32 -1.442695, %v1595_v41 }
  0xe7   : > { %v1293_v16 = vpop.eup %1292  ;;  %1318 = vrcp.f32 %v674_v11  ;;  %v672_v17 = vadd.f32 1.0, %v1291_v13  ;;  %v468_v27 = vpop.f32.mrf.mxu0  ;;  %v1606_v60 = vadd.f32 %v1235_v15, %v1522_v18  ;;  %v1115_v10 = vmul.f32 -1.442695, %v1599_v51 }
  0xe8   : > { %v1295_v19 = vpop.eup %1294  ;;  %1320 = vrcp.f32 %v656_v14  ;;  %v659_v21 = vadd.f32 1.0, %v1293_v16  ;;  %v532_v32 = vpop.f32.mrf.mxu1  ;;  %v1610_v2 = vadd.f32 %v1522_v18, %v468_v27  ;;  %v1102_v11 = vmul.f32 -1.442695, %v1602_v53 }
  0xe9   : > { %v1297_v23 = vpop.eup %1296  ;;  %1322 = vrcp.f32 %v672_v17  ;;  %v675_v24 = vadd.f32 1.0, %v1295_v19  ;;  %v1222_v47 = vpop.f32.mrf.mxu0  ;;  %v1613_v5 = vadd.f32 %v1522_v18, %v532_v32  ;;  %v1118_v15 = vmul.f32 -1.442695, %v1606_v60 }
  0xea   : > { %v1299_v29 = vpop.eup %1298  ;;  %1324 = vrcp.f32 %v659_v21  ;;  %v657_v30 = vadd.f32 1.0, %v1297_v23  ;;  %v1238_v54 = vpop.f32.mrf.mxu1  ;;  %v1616_v6 = vadd.f32 %v1222_v47, %v1522_v18  ;;  %v1100_v21 = vmul.f32 -1.442695, %v1610_v2 }
  0xeb   : > { %v1301_v33 = vpop.eup %1300  ;;  %1326 = vrcp.f32 %v675_v24  ;;  %v673_v35 = vadd.f32 1.0, %v1299_v29  ;;  %v481_v7 = vpop.f32.mrf.mxu0  ;;  %v1622_v16 = vadd.f32 %v1238_v54, %v1522_v18  ;;  %v1116_v29 = vmul.f32 -1.442695, %v1613_v5 }
  0xec   : > { %v1303_v38 = vpop.eup %1302  ;;  %1328 = vrcp.f32 %v657_v30  ;;  %v662_v39 = vadd.f32 1.0, %v1301_v33  ;;  %v545_v12 = vpop.f32.mrf.mxu1  ;;  %v1627_v23 = vadd.f32 %v1522_v18, %v481_v7 }
  0xed   : > { %v1305_v42 = vpop.eup %1304  ;;  %1330 = vrcp.f32 %v673_v35  ;;  %v678_v44 = vadd.f32 1.0, %v1303_v38  ;;  %v1223_v30 = vpop.f32.mrf.mxu0  ;;  %v1641_v38 = vadd.f32 %v1522_v18, %v545_v12  ;;  %v1121_v47 = vmul.f32 -1.442695, %v1622_v16 }
  0xee   : > { %v1307_v48 = vpop.eup %1306  ;;  %1332 = vrcp.f32 %v662_v39  ;;  %v660_v50 = vadd.f32 1.0, %v1305_v42  ;;  %v1239_v39 = vpop.f32.mrf.mxu1 }
  0xef   : > { %v1309_v56 = vpop.eup %1308  ;;  %1334 = vrcp.f32 %v678_v44  ;;  %v676_v57 = vadd.f32 1.0, %v1307_v48 }
  0xf0   : > { %v1311_v62 = vpop.eup %1310  ;;  %1336 = vrcp.f32 %v660_v50  ;;  %v663_v63 = vadd.f32 1.0, %v1309_v56 }
  0xf1   : > { %v1313_v3 = vpop.eup %1312  ;;  %1338 = vrcp.f32 %v676_v57  ;;  %v679_v4 = vadd.f32 1.0, %v1311_v62  ;;  %v1653_v57 = vadd.f32 %v1223_v30, %v1522_v18 }
  0xf2   : > { %v1315_v8 = vpop.eup %1314  ;;  %1340 = vrcp.f32 %v663_v63  ;;  %v661_v9 = vadd.f32 1.0, %v1313_v3  ;;  %v548_v3 = vpop.f32.mrf.mxu1 }
  0xf3   : > { %v1317_v13 = vpop.eup %1316  ;;  %1342 = vrcp.f32 %v679_v4  ;;  %v677_v14 = vadd.f32 1.0, %v1315_v8  ;;  %v1663_v8 = vadd.f32 %v1239_v39, %v1522_v18 }
  0xf4   : > { %v1319_v17 = vpop.eup %1318  ;;  %v754_v19 = vmul.f32 %v1317_v13, %v1525_v20  ;;  %1344 = vrcp.f32 %v661_v9  ;;  %v1105_v20 = vmul.f32 -1.442695, %v1616_v6 }
  0xf5   : > { %v1321_v24 = vpop.eup %1320  ;;  %v770_v27 = vmul.f32 %v1319_v17, %v1528_v22  ;;  %1346 = vrcp.f32 %v677_v14  ;;  %v1675_v14 = vadd.f32 %v1522_v18, %v548_v3 }
  0xf6   : > { %v1323_v32 = vpop.eup %1322  ;;  %v1159_v33 = vpack.c.bf16 %v754_v19, %v754_v19  ;;  %v752_v35 = vmul.f32 %v1321_v24, %v1532_v25  ;;  %1348 = vpow2.f32 %v1101_v45  ;;  %v1103_v45 = vmul.f32 -1.442695, %v1627_v23 }
  0xf7   : > { %v1325_v42 = vpop.eup %1324  ;;  %v1175_v44 = vpack.c.bf16 %v770_v27, %v770_v27  ;;  %v768_v22 = vmul.f32 %v1323_v32, %v1536_v28  ;;  %1350 = vpow2.f32 %v1117_v59  ;;  %v484_v59 = vpop.f32.mrf.mxu0  ;;  %v1106_v19 = vmul.f32 -1.442695, %v1653_v57 }
  0xf8   : > { %v1327_v48 = vpop.eup %1326  ;;  %915 = vst.msk [vmem:[%s1634_s27 + $0x8] sm:$0xf] %vm912_vm2, %v1159_v33  ;;  %v1157_v50 = vpack.c.bf16 %v752_v35, %v752_v35  ;;  %v755_v25 = vmul.f32 %v1325_v42, %v1540_v31  ;;  %1352 = vpow2.f32 %v1099_v1  ;;  %v1119_v1 = vmul.f32 -1.442695, %v1641_v38 }
  0xf9   : > { %v1329_v54 = vpop.eup %1328  ;;  %931 = vst.msk [vmem:[%s1634_s27 + $0x48] sm:$0xf] %vm912_vm2, %v1175_v44  ;;  %v1173_v56 = vpack.c.bf16 %v768_v22, %v768_v22  ;;  %v771_v28 = vmul.f32 %v1327_v48, %v1544_v34  ;;  %1354 = vpow2.f32 %v1115_v10  ;;  %v1120_v33 = vmul.f32 -1.442695, %v1675_v14 }
  0xfa   : > { %v1331_v62 = vpop.eup %1330  ;;  %913 = vst.msk [vmem:[%s1634_s27] sm:$0xf] %vm912_vm2, %v1157_v50  ;;  %v1160_v31 = vpack.c.bf16 %v755_v25, %v755_v25  ;;  %v753_v63 = vmul.f32 %v1329_v54, %v1548_v37  ;;  %1356 = vpow2.f32 %v1102_v11  ;;  %v1669_v11 = vadd.f32 %v1522_v18, %v484_v59 }
  0xfb   : > { %v1333_v4 = vpop.eup %1332  ;;  %929 = vst.msk [vmem:[%s1634_s27 + $0x40] sm:$0xf] %vm912_vm2, %v1173_v56  ;;  %v1176_v34 = vpack.c.bf16 %v771_v28, %v771_v28  ;;  %v769_v7 = vmul.f32 %v1331_v62, %v1552_v40  ;;  %1358 = vpow2.f32 %v1118_v15  ;;  %v1122_v18 = vmul.f32 -1.442695, %v1663_v8 }
  0xfc   : > { %v1335_v9 = vpop.eup %1334  ;;  %916 = vst.msk [vmem:[%s1634_s27 + $0xc] sm:$0xf] %vm912_vm2, %v1160_v31  ;;  %v1158_v37 = vpack.c.bf16 %v753_v63, %v753_v63  ;;  %v758_v10 = vmul.f32 %v1333_v4, %v1556_v43  ;;  %1360 = vpow2.f32 %v1100_v21 }
  0xfd   : > { %v1337_v12 = vpop.eup %1336  ;;  %932 = vst.msk [vmem:[%s1634_s27 + $0x4c] sm:$0xf] %vm912_vm2, %v1176_v34  ;;  %v1174_v40 = vpack.c.bf16 %v769_v7, %v769_v7  ;;  %v774_v13 = vmul.f32 %v1335_v9, %v1560_v46  ;;  %1362 = vpow2.f32 %v1116_v29 }
  0xfe   : > { %v1339_v15 = vpop.eup %1338  ;;  %914 = vst.msk [vmem:[%s1634_s27 + $0x4] sm:$0xf] %vm912_vm2, %v1158_v37  ;;  %v1163_v43 = vpack.c.bf16 %v758_v10, %v758_v10  ;;  %v756_v17 = vmul.f32 %v1337_v12, %v1564_v49  ;;  %1364 = vpow2.f32 %v1105_v20  ;;  %v1104_v20 = vmul.f32 -1.442695, %v1669_v11 }
  0xff   : > { %v1341_v21 = vpop.eup %1340  ;;  %930 = vst.msk [vmem:[%s1634_s27 + $0x44] sm:$0xf] %vm912_vm2, %v1174_v40  ;;  %v1179_v24 = vpack.c.bf16 %v774_v13, %v774_v13  ;;  %v772_v46 = vmul.f32 %v1339_v15, %v1568_v52  ;;  %1366 = vpow2.f32 %v1121_v47 }
 0x100   : > { %v1343_v27 = vpop.eup %1342  ;;  %919 = vst.msk [vmem:[%s1634_s27 + $0x18] sm:$0xf] %vm912_vm2, %v1163_v43  ;;  %v1161_v29 = vpack.c.bf16 %v756_v17, %v756_v17  ;;  %v759_v49 = vmul.f32 %v1341_v21, %v1572_v55  ;;  %1368 = vpow2.f32 %v1103_v45 }
 0x101   : > { %v1345_v30 = vpop.eup %1344  ;;  %935 = vst.msk [vmem:[%s1634_s27 + $0x58] sm:$0xf] %vm912_vm2, %v1179_v24  ;;  %v1177_v32 = vpack.c.bf16 %v772_v46, %v772_v46  ;;  %v775_v52 = vmul.f32 %v1343_v27, %v1576_v58  ;;  %1370 = vpow2.f32 %v1119_v1 }
 0x102   : > { %v1347_v35 = vpop.eup %1346  ;;  %917 = vst.msk [vmem:[%s1634_s27 + $0x10] sm:$0xf] %vm912_vm2, %v1161_v29  ;;  %v1164_v39 = vpack.c.bf16 %v759_v49, %v759_v49  ;;  %v757_v55 = vmul.f32 %v1345_v30, %v1580_v61  ;;  %1372 = vpow2.f32 %v1106_v19 }
 0x103   : > { %v1349_v42 = vpop.eup %1348  ;;  %933 = vst.msk [vmem:[%s1634_s27 + $0x50] sm:$0xf] %vm912_vm2, %v1177_v32  ;;  %v1180_v44 = vpack.c.bf16 %v775_v52, %v775_v52  ;;  %v773_v22 = vmul.f32 %v1347_v35, %v1584_v0  ;;  %1374 = vpow2.f32 %v1122_v18 }
 0x104   : > { %v1351_v58 = vpop.eup %1350  ;;  %920 = vst.msk [vmem:[%s1634_s27 + $0x1c] sm:$0xf] %vm912_vm2, %v1164_v39  ;;  %v1162_v47 = vpack.c.bf16 %v757_v55, %v757_v55  ;;  %v666_v48 = vadd.f32 1.0, %v1349_v42  ;;  %1376 = vpow2.f32 %v1104_v20 }
 0x105   : > { %v1353_v50 = vpop.eup %1352  ;;  %936 = vst.msk [vmem:[%s1634_s27 + $0x5c] sm:$0xf] %vm912_vm2, %v1180_v44  ;;  %v1178_v61 = vpack.c.bf16 %v773_v22, %v773_v22  ;;  %v682_v25 = vadd.f32 1.0, %v1351_v58  ;;  %1378 = vpow2.f32 %v1120_v33 }
 0x106   : > { %v1355_v45 = vpop.eup %1354  ;;  %918 = vst.msk [vmem:[%s1634_s27 + $0x14] sm:$0xf] %vm912_vm2, %v1162_v47  ;;  %1380 = vrcp.f32 %v666_v48  ;;  %v664_v54 = vadd.f32 1.0, %v1353_v50 }
 0x107   : > { %v1357_v0 = vpop.eup %1356  ;;  %934 = vst.msk [vmem:[%s1634_s27 + $0x54] sm:$0xf] %vm912_vm2, %v1178_v61  ;;  %1382 = vrcp.f32 %v682_v25  ;;  %v680_v56 = vadd.f32 1.0, %v1355_v45 }
 0x108   : > { %v1359_v28 = vpop.eup %1358  ;;  %1384 = vrcp.f32 %v664_v54  ;;  %v667_v59 = vadd.f32 1.0, %v1357_v0 }
 0x109   : > { %v1361_v62 = vpop.eup %1360  ;;  %1386 = vrcp.f32 %v680_v56  ;;  %v683_v31 = vadd.f32 1.0, %v1359_v28 }
 0x10a   : > { %v1363_v63 = vpop.eup %1362  ;;  %1388 = vrcp.f32 %v667_v59  ;;  %v665_v1 = vadd.f32 1.0, %v1361_v62 }
 0x10b   : > { %v1365_v3 = vpop.eup %1364  ;;  %1390 = vrcp.f32 %v683_v31  ;;  %v681_v4 = vadd.f32 1.0, %v1363_v63 }
 0x10c   : > { %v1367_v34 = vpop.eup %1366  ;;  %1392 = vrcp.f32 %v665_v1  ;;  %v670_v7 = vadd.f32 1.0, %v1365_v3 }
 0x10d   : > { %v1369_v9 = vpop.eup %1368  ;;  %1394 = vrcp.f32 %v681_v4  ;;  %v686_v37 = vadd.f32 1.0, %v1367_v34 }
 0x10e   : > { %v1371_v10 = vpop.eup %1370  ;;  %1396 = vrcp.f32 %v670_v7  ;;  %v668_v12 = vadd.f32 1.0, %v1369_v9 }
 0x10f   : > { %v1373_v40 = vpop.eup %1372  ;;  %1398 = vrcp.f32 %v686_v37  ;;  %v684_v13 = vadd.f32 1.0, %v1371_v10 }
 0x110   : > { %v1375_v15 = vpop.eup %1374  ;;  %1400 = vrcp.f32 %v668_v12  ;;  %v671_v43 = vadd.f32 1.0, %v1373_v40 }
 0x111   : > { %v1377_v17 = vpop.eup %1376  ;;  %1402 = vrcp.f32 %v684_v13  ;;  %v687_v19 = vadd.f32 1.0, %v1375_v15 }
 0x112   : > { %v1379_v21 = vpop.eup %1378  ;;  %1404 = vrcp.f32 %v671_v43  ;;  %v669_v24 = vadd.f32 1.0, %v1377_v17 }
 0x113   : > { %v1381_v46 = vpop.eup %1380  ;;  %1406 = vrcp.f32 %v687_v19  ;;  %v685_v18 = vadd.f32 1.0, %v1379_v21 }
 0x114   : > { %v1383_v27 = vpop.eup %1382  ;;  %v762_v29 = vmul.f32 %v1381_v46, %v1589_v26  ;;  %1408 = vrcp.f32 %v669_v24 }
 0x115   : > { %v1385_v49 = vpop.eup %1384  ;;  %v778_v20 = vmul.f32 %v1383_v27, %v1592_v36  ;;  %1410 = vrcp.f32 %v685_v18 }
 0x116   : > { %v1387_v30 = vpop.eup %1386  ;;  %v1167_v32 = vpack.c.bf16 %v762_v29, %v762_v29  ;;  %v760_v52 = vmul.f32 %v1385_v49, %v1595_v41 }
 0x117   : > { %v1389_v33 = vpop.eup %1388  ;;  %v1183_v35 = vpack.c.bf16 %v778_v20, %v778_v20  ;;  %v776_v39 = vmul.f32 %v1387_v30, %v1599_v51 }
 0x118   : > { %v1391_v55 = vpop.eup %1390  ;;  %923 = vst.msk [vmem:[%s1634_s27 + $0x28] sm:$0xf] %vm912_vm2, %v1167_v32  ;;  %v1165_v26 = vpack.c.bf16 %v760_v52, %v760_v52  ;;  %v763_v42 = vmul.f32 %v1389_v33, %v1602_v53 }
 0x119   : > { %v1393_v44 = vpop.eup %1392  ;;  %939 = vst.msk [vmem:[%s1634_s27 + $0x68] sm:$0xf] %vm912_vm2, %v1183_v35  ;;  %v1181_v36 = vpack.c.bf16 %v776_v39, %v776_v39  ;;  %v779_v22 = vmul.f32 %v1391_v55, %v1606_v60 }
 0x11a   : > { %v1395_v41 = vpop.eup %1394  ;;  %921 = vst.msk [vmem:[%s1634_s27 + $0x20] sm:$0xf] %vm912_vm2, %v1165_v26  ;;  %v1168_v58 = vpack.c.bf16 %v763_v42, %v763_v42  ;;  %v761_v51 = vmul.f32 %v1393_v44, %v1610_v2 }
 0x11b   : > { %v1397_v47 = vpop.eup %1396  ;;  %937 = vst.msk [vmem:[%s1634_s27 + $0x60] sm:$0xf] %vm912_vm2, %v1181_v36  ;;  %v1184_v48 = vpack.c.bf16 %v779_v22, %v779_v22  ;;  %v777_v53 = vmul.f32 %v1395_v41, %v1613_v5 }
 0x11c   : > { %v1399_v50 = vpop.eup %1398  ;;  %924 = vst.msk [vmem:[%s1634_s27 + $0x2c] sm:$0xf] %vm912_vm2, %v1168_v58  ;;  %v1166_v61 = vpack.c.bf16 %v761_v51, %v761_v51  ;;  %v766_v60 = vmul.f32 %v1397_v47, %v1616_v6 }
 0x11d   : > { %v1401_v25 = vpop.eup %1400  ;;  %940 = vst.msk [vmem:[%s1634_s27 + $0x6c] sm:$0xf] %vm912_vm2, %v1184_v48  ;;  %v1182_v45 = vpack.c.bf16 %v777_v53, %v777_v53  ;;  %v782_v2 = vmul.f32 %v1399_v50, %v1622_v16 }
 0x11e   : > { %v1403_v54 = vpop.eup %1402  ;;  %922 = vst.msk [vmem:[%s1634_s27 + $0x24] sm:$0xf] %vm912_vm2, %v1166_v61  ;;  %v1171_v0 = vpack.c.bf16 %v766_v60, %v766_v60  ;;  %v764_v5 = vmul.f32 %v1401_v25, %v1627_v23 }
 0x11f   : > { %v1405_v56 = vpop.eup %1404  ;;  %938 = vst.msk [vmem:[%s1634_s27 + $0x64] sm:$0xf] %vm912_vm2, %v1182_v45  ;;  %v1187_v28 = vpack.c.bf16 %v782_v2, %v782_v2  ;;  %v780_v6 = vmul.f32 %v1403_v54, %v1641_v38 }
 0x120   : > { %v1407_v59 = vpop.eup %1406  ;;  %927 = vst.msk [vmem:[%s1634_s27 + $0x38] sm:$0xf] %vm912_vm2, %v1171_v0  ;;  %v1169_v16 = vpack.c.bf16 %v764_v5, %v764_v5  ;;  %v767_v62 = vmul.f32 %v1405_v56, %v1653_v57 }
 0x121   : > { %v1409_v31 = vpop.eup %1408  ;;  %943 = vst.msk [vmem:[%s1634_s27 + $0x78] sm:$0xf] %vm912_vm2, %v1187_v28  ;;  %v1185_v23 = vpack.c.bf16 %v780_v6, %v780_v6  ;;  %v783_v63 = vmul.f32 %v1407_v59, %v1663_v8 }
 0x122   : > { %v1411_v1 = vpop.eup %1410  ;;  %925 = vst.msk [vmem:[%s1634_s27 + $0x30] sm:$0xf] %vm912_vm2, %v1169_v16  ;;  %v1172_v38 = vpack.c.bf16 %v767_v62, %v767_v62  ;;  %v765_v3 = vmul.f32 %v1409_v31, %v1669_v11 }
 0x123   : > { %941 = vst.msk [vmem:[%s1634_s27 + $0x70] sm:$0xf] %vm912_vm2, %v1185_v23  ;;  %v1188_v4 = vpack.c.bf16 %v783_v63, %v783_v63  ;;  %v781_v34 = vmul.f32 %v1411_v1, %v1675_v14 }
 0x124   : > { %928 = vst.msk [vmem:[%s1634_s27 + $0x3c] sm:$0xf] %vm912_vm2, %v1172_v38  ;;  %v1170_v57 = vpack.c.bf16 %v765_v3, %v765_v3 }
 0x125   : > { %944 = vst.msk [vmem:[%s1634_s27 + $0x7c] sm:$0xf] %vm912_vm2, %v1188_v4  ;;  %v1186_v7 = vpack.c.bf16 %v781_v34, %v781_v34 }
 0x126   : > { %926 = vst.msk [vmem:[%s1634_s27 + $0x34] sm:$0xf] %vm912_vm2, %v1170_v57 }
 0x127   : > { %942 = vst.msk [vmem:[%s1634_s27 + $0x74] sm:$0xf] %vm912_vm2, %v1186_v7 }
 0x128 PF: > { %s13_s14 = sadd.s32 1, %s1434_s14   ;;  %s1768_s12 = smov %s1430_s13 }
 0x129   : > { %p10_p5 = scmp.ge.s32.totalorder %s13_s14, 4   ;;  %s1769_s13 = smov %s1771_s15 }
 0x12b   :  { %12 = sbr.rel (!%p10_p5) target bundleno = 2 (0x2), region = 68 }

</bundles_post_ra>
